<compile_context>
chip_gen: v5e
topology: v5e:2x2
jax: 0.10.0
libtpu: 0.0.40
codegen_flags: <defaults>
</compile_context>

<pallas_src>
import functools
from typing import NamedTuple

import jax
import jax.numpy as jnp
from jax.experimental import pallas as pl
from jax.experimental.pallas import tpu as pltpu

STEP_SIZE = 1.0  # `step_size` global in the PyTorch file


def _round_up(n: int, m: int) -> int:
    return -(-n // m) * m


# ---------------------------------------------------------------------------
# One-time parameter precompute (per weight matrix W). Plain XLA ops: tiny,
# parameter-only, amortized across every forward call / FPI iteration.
# ---------------------------------------------------------------------------
class GParams(NamedTuple):
    A: jax.Array    # (D_pad, D_pad) mm_dtype: I - step * (W @ W^T), zero-padded
    Wt: jax.Array   # (M_pad, D_pad) mm_dtype: step * W^T, zero-padded
    D: int
    M: int


def prepare_g_params(W, *, step_size=STEP_SIZE, mm_dtype=jnp.bfloat16):
    D, M = W.shape
    D_pad = _round_up(D, 128)
    M_pad = _round_up(M, 128)

    Wf = W.astype(jnp.float32)
    Wp = jnp.pad(Wf, ((0, D_pad - D), (0, M_pad - M)))
    # Full-f32 Gram (parameter-only; precision pinned so the mm_dtype=float32
    # path stays exact regardless of the backend's default matmul precision).
    G1 = jnp.dot(Wp, Wp.T, precision=jax.lax.Precision.HIGHEST)
    A = (jnp.eye(D_pad, dtype=jnp.float32) - step_size * G1).astype(mm_dtype)
    Wt = (step_size * Wp.T).astype(mm_dtype)            # NN-form, pre-scaled
    return GParams(A=A, Wt=Wt, D=D, M=M)


# ---------------------------------------------------------------------------
# Per-call GD-step kernel (row-tiled):  X <- X @ A + y @ (step*W^T)
# ---------------------------------------------------------------------------
def _gd_step_kernel(x_ref, y_ref, wt_ref, a_ref, o_ref, *, num_steps):
    # C' = step*(y @ W^T): NN-form matmul, both operands already mm_dtype
    # (no per-tile casts of resident blocks, no XLU transpose).
    Cp = jnp.dot(y_ref[...], wt_ref[...], preferred_element_type=jnp.float32)
    A = a_ref[...]                        # resident, already mm_dtype
    X0 = x_ref[...].astype(jnp.float32)   # state kept in f32 across steps

    def body(_, X):
        return jnp.dot(X.astype(A.dtype), A,
                       preferred_element_type=jnp.float32) + Cp

    Xn = jax.lax.fori_loop(0, num_steps, body, X0, unroll=True)
    o_ref[...] = Xn.astype(o_ref.dtype)


def g_forward(x_tuple, y, params: GParams, *, num_steps=1, tb_rows=None):
    """JAX/Pallas equivalent of G(cfun).forward(x, y) -> (X_new,).

    `params` comes from prepare_g_params(W) (hoisted, parameter-only work).
    num_steps=1 matches G.forward exactly; num_steps>1 fuses that many GD
    iterations (the FPI use case) into a single kernel launch.
    """
    (X,) = x_tuple
    B, D = X.shape
    assert D == params.D and y.shape == (B, params.M)
    D_pad = params.A.shape[0]
    M_pad = params.Wt.shape[0]
    mm_dtype = params.Wt.dtype

    # Row tiling: prefer large tiles (fewer ~0.35us grid steps on single-TC
    # v5e/v6e) but keep >=2 tiles so v7x's two TensorCores both get work and
    # BlockSpec double-buffering can overlap DMA with compute.
    B_pad = _round_up(max(B, 8), 8)
    if tb_rows is None:
        tb_rows = max(8, min(512, _round_up(-(-B_pad // 2), 8)))
    TB = min(_round_up(tb_rows, 8), B_pad)
    B_pad = _round_up(B_pad, TB)

    # Single fused pad per input (no zeros + dynamic-update-slice round trip).
    # y is pre-cast to mm_dtype here so the kernel never casts full y tiles.
    Xp = jnp.pad(X, ((0, B_pad - B), (0, D_pad - D)))
    Yp = jnp.pad(y.astype(mm_dtype), ((0, B_pad - B), (0, M_pad - params.M)))

    # Explicit VMEM budget: double-buffered X/y/out tiles + resident A, W^T.
    isz_mm = jnp.dtype(mm_dtype).itemsize
    isz_x = jnp.dtype(X.dtype).itemsize
    resident = 2 * (D_pad * D_pad + M_pad * D_pad) * isz_mm
    tiles = 2 * TB * (D_pad * isz_x + M_pad * isz_mm + D_pad * isz_x)
    vmem_limit = int(min(max(32 << 20, resident + tiles + (2 << 20)), 64 << 20))

    kernel = functools.partial(_gd_step_kernel, num_steps=int(num_steps))

    X_new = pl.pallas_call(
        kernel,
        out_shape=jax.ShapeDtypeStruct((B_pad, D_pad), X.dtype),
        grid=(B_pad // TB,),
        in_specs=[
            pl.BlockSpec((TB, D_pad), lambda i: (i, 0)),      # X row tile
            pl.BlockSpec((TB, M_pad), lambda i: (i, 0)),      # y row tile
            pl.BlockSpec((M_pad, D_pad), lambda i: (0, 0)),   # step*W^T (resident)
            pl.BlockSpec((D_pad, D_pad), lambda i: (0, 0)),   # A        (resident)
        ],
        out_specs=pl.BlockSpec((TB, D_pad), lambda i: (i, 0)),
        input_output_aliases={0: 0},   # output reuses padded-X HBM buffer
        compiler_params=pltpu.CompilerParams(
            dimension_semantics=("parallel",),   # megacore / v7x 2-TC sharding
            vmem_limit_bytes=vmem_limit,
        ),
    )(Xp, Yp, params.Wt, params.A)

    if B_pad == B and D_pad == D:
        return (X_new,)
    return (X_new[:B, :D],)


if __name__ == "__main__":
    key = jax.random.PRNGKey(0)
    kx, ky, kw = jax.random.split(key, 3)

    # Small shapes consistent with the module; B=256 gives 2 row tiles.
    B, D, M = 256, 32, 48
    X = jax.random.normal(kx, (B, D), dtype=jnp.float32)
    y = jax.random.normal(ky, (B, M), dtype=jnp.float32)
    # Deterministic synthetic parameter for cfun (not loaded from disk).
    W = jax.random.normal(kw, (D, M), dtype=jnp.float32) / jnp.sqrt(D)

    def grad_ref(Xv):
        return jax.grad(lambda Xq: 0.5 * jnp.sum((Xq @ W - y) ** 2))(Xv)

    # Parameter-only precompute: done ONCE per W, reused by every call below.
    params_f32 = prepare_g_params(W, mm_dtype=jnp.float32)   # exact-semantics
    params_bf16 = prepare_g_params(W)                        # default bf16 MXU

    # f32-accurate references (independent of the backend's default matmul
    # precision).
    with jax.default_matmul_precision("highest"):
        X_ref = X - STEP_SIZE * grad_ref(X)
        X_it = X
        for _ in range(3):
            X_it = X_it - STEP_SIZE * grad_ref(X_it)

    # (1) Exact-semantics path: f32 matmuls, single GD step == G.forward.
    fwd_f32 = jax.jit(lambda X_, y_: g_forward((X_,), y_, params_f32))
    (X_new,) = fwd_f32(X, y)
    X_new = jax.block_until_ready(X_new)
    assert X_new.shape == X.shape and X_new.dtype == X.dtype
    assert jnp.allclose(X_new, X_ref, atol=1e-4, rtol=1e-4)

    # (2) bf16-MXU path (f32 accumulation); only operand rounding differs.
    fwd_bf16 = jax.jit(lambda X_, y_: g_forward((X_,), y_, params_bf16))
    (X_bf,) = fwd_bf16(X, y)
    X_bf = jax.block_until_ready(X_bf)
    rel = jnp.linalg.norm(X_bf - X_ref) / jnp.linalg.norm(X_ref)
    assert rel < 2e-2

    # (3) Fused multi-step (FPI use case): 3 GD steps in one kernel launch.
    fwd3 = jax.jit(lambda X_, y_: g_forward((X_,), y_, params_f32, num_steps=3))
    (X_3,) = fwd3(X, y)
    X_3 = jax.block_until_ready(X_3)
    assert jnp.allclose(X_3, X_it, atol=1e-3, rtol=1e-3)

    print("KERNEL_OK")
</pallas_src>

<mosaic_0001>
module attributes {stable_mosaic.version = 11 : i64} {
  func.func @_gd_step_kernel(%arg0: i32, %arg1: memref<128x128xf32, #tpu.memory_space<vmem>>, %arg2: memref<128x128xf32, #tpu.memory_space<vmem>>, %arg3: memref<128x128xf32, #tpu.memory_space<vmem>>, %arg4: memref<128x128xf32, #tpu.memory_space<vmem>>, %arg5: memref<128x128xf32, #tpu.memory_space<vmem>>) attributes {dimension_semantics = [#tpu.dimension_semantics<parallel>], iteration_bounds = array<i64: 2>, scalar_prefetch = 0 : i64, scratch_operands = 0 : i64, tpu.core_type = #tpu.core_type<tc>, window_params = [{transform_indices = @transform_0, window_bounds = array<i64: 128, 128>}, {transform_indices = @transform_1, window_bounds = array<i64: 128, 128>}, {pipeline_mode = #tpu.pipeline_mode<synchronous>, transform_indices = @transform_2, window_bounds = array<i64: 128, 128>}, {pipeline_mode = #tpu.pipeline_mode<synchronous>, transform_indices = @transform_3, window_bounds = array<i64: 128, 128>}, {transform_indices = @transform_4, window_bounds = array<i64: 128, 128>}]} {
    %c0 = arith.constant 0 : index
    %c0_0 = arith.constant 0 : index
    %0 = vector.load %arg2[%c0, %c0_0] : memref<128x128xf32, #tpu.memory_space<vmem>>, vector<128x128xf32>
    %c0_1 = arith.constant 0 : index
    %c0_2 = arith.constant 0 : index
    %1 = vector.load %arg3[%c0_1, %c0_2] : memref<128x128xf32, #tpu.memory_space<vmem>>, vector<128x128xf32>
    %cst = arith.constant dense<0.000000e+00> : vector<128x128xf32>
    %2 = tpu.matmul %0, %1, %cst {dimension_numbers = #tpu.dot_dimension_numbers<[1], [0], [0], [1], [0, 0, 1, 1], [], []>} : vector<128x128xf32>, vector<128x128xf32>, vector<128x128xf32> -> vector<128x128xf32>
    %c0_3 = arith.constant 0 : index
    %c0_4 = arith.constant 0 : index
    %3 = vector.load %arg4[%c0_3, %c0_4] : memref<128x128xf32, #tpu.memory_space<vmem>>, vector<128x128xf32>
    %c0_5 = arith.constant 0 : index
    %c0_6 = arith.constant 0 : index
    %4 = vector.load %arg1[%c0_5, %c0_6] : memref<128x128xf32, #tpu.memory_space<vmem>>, vector<128x128xf32>
    %c0_i32 = arith.constant 0 : i32
    %cst_7 = arith.constant dense<0.000000e+00> : vector<128x128xf32>
    %5 = tpu.matmul %4, %3, %cst_7 {dimension_numbers = #tpu.dot_dimension_numbers<[1], [0], [0], [1], [0, 0, 1, 1], [], []>} : vector<128x128xf32>, vector<128x128xf32>, vector<128x128xf32> -> vector<128x128xf32>
    %6 = arith.addf %5, %2 : vector<128x128xf32>
    %c0_8 = arith.constant 0 : index
    %c0_9 = arith.constant 0 : index
    %7 = vector.load %arg5[%c0_8, %c0_9] : memref<128x128xf32, #tpu.memory_space<vmem>>, vector<128x128xf32>
    tpu.vector_store %arg5[%c0_8, %c0_9], %6 {strides = array<i32>} : memref<128x128xf32, #tpu.memory_space<vmem>>, vector<128x128xf32>,
    return
  }
  func.func @transform_0(%arg0: i32) -> (i32, i32) {
    %c0_i32 = arith.constant 0 : i32
    %c0_i32_0 = arith.constant 0 : i32
    return %arg0, %c0_i32 : i32, i32
  }
  func.func @transform_1(%arg0: i32) -> (i32, i32) {
    %c0_i32 = arith.constant 0 : i32
    %c0_i32_0 = arith.constant 0 : i32
    return %arg0, %c0_i32 : i32, i32
  }
  func.func @transform_2(%arg0: i32) -> (i32, i32) {
    %c0_i32 = arith.constant 0 : i32
    %c0_i32_0 = arith.constant 0 : i32
    %c0_i32_1 = arith.constant 0 : i32
    return %c0_i32, %c0_i32_0 : i32, i32
  }
  func.func @transform_3(%arg0: i32) -> (i32, i32) {
    %c0_i32 = arith.constant 0 : i32
    %c0_i32_0 = arith.constant 0 : i32
    %c0_i32_1 = arith.constant 0 : i32
    return %c0_i32, %c0_i32_0 : i32, i32
  }
  func.func @transform_4(%arg0: i32) -> (i32, i32) {
    %c0_i32 = arith.constant 0 : i32
    %c0_i32_0 = arith.constant 0 : i32
    return %arg0, %c0_i32 : i32, i32
  }
}

</mosaic_0001>

<bundles_post_ra>
// kernel: _lambda_.1
= control target key start
LH: loop header
LB: loop body
LE: loop exit
PB: predicated region body
PF: predicated region fallthrough
CT: control target
= control target key end

     0   :  { %s587_s15 = smov 0   ;;  %s764_s0 = inlined_call_operand.vmem [shape: f32[256,128], index: 0, kind: input, shape index: {}, may-alias: {0,4}]   ;;  %s765_s1 = inlined_call_operand.vmem [shape: f32[256,128], index: 1, kind: input, shape index: {}]   ;;  %s766_s2 = inlined_call_operand.vmem [shape: f32[128,128], index: 2, kind: input, shape index: {}]   ;;  %s767_s3 = inlined_call_operand.vmem [shape: f32[128,128], index: 3, kind: input, shape index: {}]   ;;  %s768_s4 = inlined_call_operand.vmem [shape: f32[256,128], index: 4, kind: output, shape index: {}, may-alias: {0,4}]  }
   0x1 LB: > { %s501_s16 = sadd.s32 4294967295, %s560_s15   ;;  %p505_p0 = scmp.ge.s32.totalorder %s560_s15, 1  ;;  %s560_s15 = sphi %s587_s15, %s14_s15  }
   0x2   : > { %p174_p1 = scmp.lt.s32.totalorder %s560_s15, 3 }
   0x4   : > { %p175_p2 = pnand %p505_p0, %p174_p1 }
   0x5   : > { %s506_s25 = sshll.u32 (!%p175_p2), %s501_s16, 4 }
   0x6   : > { %178 = sbr.rel (%p175_p2) target bundleno = 235 (0xeb), region = 36  ;;  %p206_p3 = scmp.lt.s32.totalorder (!%p175_p2), %s506_s25, 31 }
   0xb   : > { %v254_v0 = vld [vmem:[%s766_s2 + $0x78] sm:$0xff]  ;;  %v253_v2 = vld [vmem:[%s766_s2 + $0x70] sm:$0xff]  ;;  %v252_v4 = vld [vmem:[%s766_s2 + $0x68] sm:$0xff]  ;;  %s770_s25 = smov (!%p206_p3, %s506_s25), 31 }
   0xc   : > { %v335_v1 = vld [vmem:[%s767_s3 + $0x78] sm:$0xff]  ;;  %514 = vmatpush.msra.mxu2 %v254_v0  ;;  %v334_v3 = vld [vmem:[%s767_s3 + $0x70] sm:$0xff]  ;;  %v333_v5 = vld [vmem:[%s767_s3 + $0x68] sm:$0xff]  ;;  %255 = vmatpush.msra.mxu0 %v254_v0  ;;  %s675_s21 = sshll.u32 %s770_s25, 3 }
   0xd   : > { %530 = vmatpush.msra.mxu3 %v335_v1  ;;  %352 = vmatpush.msra.mxu1 %v335_v1  ;;  %v251_v6 = vld [vmem:[%s766_s2 + $0x60] sm:$0xff]  ;;  %v250_v8 = vld [vmem:[%s766_s2 + $0x58] sm:$0xff]  ;;  %v249_v10 = vld [vmem:[%s766_s2 + $0x50] sm:$0xff]  ;;  %s693_s16 = scalar_lea.vmem %s764_s0, %s675_s21  ;;  %s699_s8 = scalar_lea.vmem %s765_s1, %s675_s21 }
   0xe   : > { %515 = vmatpush.msra.mxu2 %v253_v2  ;;  %v332_v7 = vld [vmem:[%s767_s3 + $0x60] sm:$0xff]  ;;  %256 = vmatpush.msra.mxu0 %v253_v2  ;;  %v331_v9 = vld [vmem:[%s767_s3 + $0x58] sm:$0xff]  ;;  %v330_v11 = vld [vmem:[%s767_s3 + $0x50] sm:$0xff]  ;;  %s743_s17 = scalar_lea.vmem %s768_s4, %s675_s21 }
   0xf   : > { %531 = vmatpush.msra.mxu3 %v334_v3  ;;  %353 = vmatpush.msra.mxu1 %v334_v3  ;;  %v248_v12 = vld [vmem:[%s766_s2 + $0x48] sm:$0xff]  ;;  %v247_v14 = vld [vmem:[%s766_s2 + $0x40] sm:$0xff]  ;;  %v246_v16 = vld [vmem:[%s766_s2 + $0x38] sm:$0xff] }
  0x10   : > { %516 = vmatpush.msra.mxu2 %v252_v4  ;;  %257 = vmatpush.msra.mxu0 %v252_v4  ;;  %v329_v13 = vld [vmem:[%s767_s3 + $0x48] sm:$0xff]  ;;  %v328_v15 = vld [vmem:[%s767_s3 + $0x40] sm:$0xff]  ;;  %v327_v17 = vld [vmem:[%s767_s3 + $0x38] sm:$0xff] }
  0x11   : > { %532 = vmatpush.msra.mxu3 %v333_v5  ;;  %354 = vmatpush.msra.mxu1 %v333_v5  ;;  %v245_v18 = vld [vmem:[%s766_s2 + $0x30] sm:$0xff]  ;;  %v244_v20 = vld [vmem:[%s766_s2 + $0x28] sm:$0xff]  ;;  %v243_v22 = vld [vmem:[%s766_s2 + $0x20] sm:$0xff] }
  0x12   : > { %517 = vmatpush.msra.mxu2 %v251_v6  ;;  %258 = vmatpush.msra.mxu0 %v251_v6  ;;  %v326_v19 = vld [vmem:[%s767_s3 + $0x30] sm:$0xff]  ;;  %v325_v21 = vld [vmem:[%s767_s3 + $0x28] sm:$0xff]  ;;  %v324_v23 = vld [vmem:[%s767_s3 + $0x20] sm:$0xff] }
  0x13   : > { %533 = vmatpush.msra.mxu3 %v332_v7  ;;  %355 = vmatpush.msra.mxu1 %v332_v7  ;;  %v242_v24 = vld [vmem:[%s766_s2 + $0x18] sm:$0xff]  ;;  %v241_v26 = vld [vmem:[%s766_s2 + $0x10] sm:$0xff]  ;;  %v240_v28 = vld [vmem:[%s766_s2 + $0x8] sm:$0xff] }
  0x14   : > { %518 = vmatpush.msra.mxu2 %v250_v8  ;;  %259 = vmatpush.msra.mxu0 %v250_v8  ;;  %v323_v25 = vld [vmem:[%s767_s3 + $0x18] sm:$0xff]  ;;  %v322_v27 = vld [vmem:[%s767_s3 + $0x10] sm:$0xff]  ;;  %v321_v29 = vld [vmem:[%s767_s3 + $0x8] sm:$0xff] }
  0x15   : > { %534 = vmatpush.msra.mxu3 %v331_v9  ;;  %356 = vmatpush.msra.mxu1 %v331_v9  ;;  %v239_v30 = vld [vmem:[%s766_s2] sm:$0xff]  ;;  %v232_v36 = vld [vmem:[%s699_s8 + $0x48] sm:$0xff]  ;;  %v233_v40 = vld [vmem:[%s699_s8 + $0x50] sm:$0xff] }
  0x16   : > { %519 = vmatpush.msra.mxu2 %v249_v10  ;;  %260 = vmatpush.msra.mxu0 %v249_v10  ;;  %v320_v31 = vld [vmem:[%s767_s3] sm:$0xff]  ;;  %v345_v37 = vld [vmem:[%s693_s16 + $0x48] sm:$0xff]  ;;  %v346_v41 = vld [vmem:[%s693_s16 + $0x50] sm:$0xff] }
  0x17   : > { %535 = vmatpush.msra.mxu3 %v330_v11  ;;  %357 = vmatpush.msra.mxu1 %v330_v11  ;;  %v231_v32 = vld [vmem:[%s699_s8 + $0x40] sm:$0xff]  ;;  %v224_v38 = vld [vmem:[%s699_s8 + $0x8] sm:$0xff]  ;;  %v225_v42 = vld [vmem:[%s699_s8 + $0x10] sm:$0xff] }
  0x18   : > { %520 = vmatpush.msra.mxu2 %v248_v12  ;;  %261 = vmatpush.msra.mxu0 %v248_v12  ;;  %v344_v33 = vld [vmem:[%s693_s16 + $0x40] sm:$0xff]  ;;  %v337_v39 = vld [vmem:[%s693_s16 + $0x8] sm:$0xff]  ;;  %v338_v43 = vld [vmem:[%s693_s16 + $0x10] sm:$0xff] }
  0x19   : > { %536 = vmatpush.msra.mxu3 %v329_v13  ;;  %358 = vmatpush.msra.mxu1 %v329_v13  ;;  %v223_v34 = vld [vmem:[%s699_s8] sm:$0xff]  ;;  %v234_v44 = vld [vmem:[%s699_s8 + $0x58] sm:$0xff]  ;;  %v236_v52 = vld [vmem:[%s699_s8 + $0x68] sm:$0xff] }
  0x1a   : > { %521 = vmatpush.msra.mxu2 %v247_v14  ;;  %262 = vmatpush.msra.mxu0 %v247_v14  ;;  %v336_v35 = vld [vmem:[%s693_s16] sm:$0xff]  ;;  %v347_v45 = vld [vmem:[%s693_s16 + $0x58] sm:$0xff]  ;;  %v349_v53 = vld [vmem:[%s693_s16 + $0x68] sm:$0xff] }
  0x1b   : > { %537 = vmatpush.msra.mxu3 %v328_v15  ;;  %359 = vmatpush.msra.mxu1 %v328_v15  ;;  %v226_v46 = vld [vmem:[%s699_s8 + $0x18] sm:$0xff]  ;;  %v235_v48 = vld [vmem:[%s699_s8 + $0x60] sm:$0xff]  ;;  %v228_v54 = vld [vmem:[%s699_s8 + $0x28] sm:$0xff] }
  0x1c   : > { %522 = vmatpush.msra.mxu2 %v246_v16  ;;  %263 = vmatpush.msra.mxu0 %v246_v16  ;;  %v339_v47 = vld [vmem:[%s693_s16 + $0x18] sm:$0xff]  ;;  %v348_v49 = vld [vmem:[%s693_s16 + $0x60] sm:$0xff]  ;;  %v341_v55 = vld [vmem:[%s693_s16 + $0x28] sm:$0xff] }
  0x1d   : > { %538 = vmatpush.msra.mxu3 %v327_v17  ;;  %360 = vmatpush.msra.mxu1 %v327_v17  ;;  %v227_v50 = vld [vmem:[%s699_s8 + $0x20] sm:$0xff]  ;;  %v237_v56 = vld [vmem:[%s699_s8 + $0x70] sm:$0xff]  ;;  %v238_v60 = vld [vmem:[%s699_s8 + $0x78] sm:$0xff] }
  0x1e   : > { %523 = vmatpush.msra.mxu2 %v245_v18  ;;  %264 = vmatpush.msra.mxu0 %v245_v18  ;;  %v340_v51 = vld [vmem:[%s693_s16 + $0x20] sm:$0xff]  ;;  %v350_v57 = vld [vmem:[%s693_s16 + $0x70] sm:$0xff]  ;;  %v351_v61 = vld [vmem:[%s693_s16 + $0x78] sm:$0xff] }
  0x1f   : > { %539 = vmatpush.msra.mxu3 %v326_v19  ;;  %361 = vmatpush.msra.mxu1 %v326_v19  ;;  %v229_v58 = vld [vmem:[%s699_s8 + $0x30] sm:$0xff]  ;;  %v230_v62 = vld [vmem:[%s699_s8 + $0x38] sm:$0xff] }
  0x20   : > { %524 = vmatpush.msra.mxu2 %v244_v20  ;;  %265 = vmatpush.msra.mxu0 %v244_v20  ;;  %v342_v59 = vld [vmem:[%s693_s16 + $0x30] sm:$0xff]  ;;  %v343_v63 = vld [vmem:[%s693_s16 + $0x38] sm:$0xff] }
  0x21   : > { %540 = vmatpush.msra.mxu3 %v325_v21  ;;  %362 = vmatpush.msra.mxu1 %v325_v21 }
  0x22   : > { %525 = vmatpush.msra.mxu2 %v243_v22  ;;  %266 = vmatpush.msra.mxu0 %v243_v22 }
  0x23   : > { %541 = vmatpush.msra.mxu3 %v324_v23  ;;  %363 = vmatpush.msra.mxu1 %v324_v23 }
  0x24   : > { %526 = vmatpush.msra.mxu2 %v242_v24  ;;  %267 = vmatpush.msra.mxu0 %v242_v24 }
  0x25   : > { %542 = vmatpush.msra.mxu3 %v323_v25  ;;  %364 = vmatpush.msra.mxu1 %v323_v25 }
  0x26   : > { %527 = vmatpush.msra.mxu2 %v241_v26  ;;  %268 = vmatpush.msra.mxu0 %v241_v26 }
  0x27   : > { %543 = vmatpush.msra.mxu3 %v322_v27  ;;  %365 = vmatpush.msra.mxu1 %v322_v27 }
  0x28   : > { %528 = vmatpush.msra.mxu2 %v240_v28  ;;  %269 = vmatpush.msra.mxu0 %v240_v28 }
  0x29   : > { %544 = vmatpush.msra.mxu3 %v321_v29  ;;  %366 = vmatpush.msra.mxu1 %v321_v29 }
  0x2a   : > { %529 = vmatpush.msra.mxu2 %v239_v30  ;;  %270 = vmatpush.msra.mxu0 %v239_v30 }
  0x2b   : > { %545 = vmatpush.msra.mxu3 %v320_v31  ;;  %295 = vmatmul.f32.vlgmr.msra.gmra.mxu2 %v231_v32 }
  0x2c   : > { %392 = vmatmul.f32.vlgmr.msra.gmra.mxu3 %v344_v33  ;;  %367 = vmatpush.msra.mxu1 %v320_v31 }
  0x2d   : > { %271 = vmatmul.f32.vlgmr.msra.gmra.mxu0 %v223_v34  ;;  %368 = vmatmul.f32.vlgmr.msra.gmra.mxu1 %v336_v35 }
  0x33   : > { %298 = vmatmul.f32.gmra.mxu2 %v232_v36 }
  0x34   : > { %395 = vmatmul.f32.gmra.mxu3 %v345_v37 }
  0x35   : > { %274 = vmatmul.f32.gmra.mxu0 %v224_v38  ;;  %371 = vmatmul.f32.gmra.mxu1 %v337_v39 }
  0x3b   : > { %301 = vmatmul.f32.gmra.mxu2 %v233_v40 }
  0x3c   : > { %398 = vmatmul.f32.gmra.mxu3 %v346_v41 }
  0x3d   : > { %277 = vmatmul.f32.gmra.mxu0 %v225_v42  ;;  %374 = vmatmul.f32.gmra.mxu1 %v338_v43 }
  0x43   : > { %304 = vmatmul.f32.gmra.mxu2 %v234_v44 }
  0x44   : > { %401 = vmatmul.f32.gmra.mxu3 %v347_v45 }
  0x45   : > { %280 = vmatmul.f32.gmra.mxu0 %v226_v46  ;;  %377 = vmatmul.f32.gmra.mxu1 %v339_v47 }
  0x4b   : > { %307 = vmatmul.f32.gmra.mxu2 %v235_v48 }
  0x4c   : > { %404 = vmatmul.f32.gmra.mxu3 %v348_v49 }
  0x4d   : > { %283 = vmatmul.f32.gmra.mxu0 %v227_v50  ;;  %380 = vmatmul.f32.gmra.mxu1 %v340_v51 }
  0x53   : > { %310 = vmatmul.f32.gmra.mxu2 %v236_v52 }
  0x54   : > { %407 = vmatmul.f32.gmra.mxu3 %v349_v53 }
  0x55   : > { %286 = vmatmul.f32.gmra.mxu0 %v228_v54  ;;  %383 = vmatmul.f32.gmra.mxu1 %v341_v55 }
  0x5b   : > { %313 = vmatmul.f32.gmra.mxu2 %v237_v56 }
  0x5c   : > { %410 = vmatmul.f32.gmra.mxu3 %v350_v57 }
  0x5d   : > { %289 = vmatmul.f32.gmra.mxu0 %v229_v58  ;;  %386 = vmatmul.f32.gmra.mxu1 %v342_v59 }
  0x63   : > { %316 = vmatmul.f32.gmra.mxu2 %v238_v60 }
  0x64   : > { %413 = vmatmul.f32.gmra.mxu3 %v351_v61 }
  0x65   : > { %292 = vmatmul.f32.gmra.mxu0 %v230_v62  ;;  %389 = vmatmul.f32.gmra.mxu1 %v343_v63 }
  0xaa   : > { %v272_v0 = vpop.f32.mrf.mxu0  ;;  %v369_v1 = vpop.f32.mrf.mxu1 }
  0xab   : > { %v370_v2 = vadd.f32 %v369_v1, %v272_v0 }
  0xad   : > { %417 = vst [vmem:[%s743_s17] sm:$0xff] %v370_v2 }
  0xae   : > { %v296_v3 = vpop.f32.mrf.mxu2 }
  0xaf   : > { %v393_v4 = vpop.f32.mrf.mxu3 }
  0xb0   : > { %v394_v5 = vadd.f32 %v393_v4, %v296_v3 }
  0xb2   : > { %425 = vst [vmem:[%s743_s17 + $0x40] sm:$0xff] %v394_v5  ;;  %v275_v6 = vpop.f32.mrf.mxu0  ;;  %v372_v7 = vpop.f32.mrf.mxu1 }
  0xb3   : > { %v373_v8 = vadd.f32 %v372_v7, %v275_v6 }
  0xb5   : > { %418 = vst [vmem:[%s743_s17 + $0x8] sm:$0xff] %v373_v8 }
  0xb6   : > { %v299_v9 = vpop.f32.mrf.mxu2 }
  0xb7   : > { %v396_v10 = vpop.f32.mrf.mxu3 }
  0xb8   : > { %v397_v11 = vadd.f32 %v396_v10, %v299_v9 }
  0xba   : > { %426 = vst [vmem:[%s743_s17 + $0x48] sm:$0xff] %v397_v11  ;;  %v278_v12 = vpop.f32.mrf.mxu0  ;;  %v375_v13 = vpop.f32.mrf.mxu1 }
  0xbb   : > { %v376_v14 = vadd.f32 %v375_v13, %v278_v12 }
  0xbd   : > { %419 = vst [vmem:[%s743_s17 + $0x10] sm:$0xff] %v376_v14 }
  0xbe   : > { %v302_v15 = vpop.f32.mrf.mxu2 }
  0xbf   : > { %v399_v16 = vpop.f32.mrf.mxu3 }
  0xc0   : > { %v400_v17 = vadd.f32 %v399_v16, %v302_v15 }
  0xc2   : > { %427 = vst [vmem:[%s743_s17 + $0x50] sm:$0xff] %v400_v17  ;;  %v281_v18 = vpop.f32.mrf.mxu0  ;;  %v378_v19 = vpop.f32.mrf.mxu1 }
  0xc3   : > { %v379_v20 = vadd.f32 %v378_v19, %v281_v18 }
  0xc5   : > { %420 = vst [vmem:[%s743_s17 + $0x18] sm:$0xff] %v379_v20 }
  0xc6   : > { %v305_v21 = vpop.f32.mrf.mxu2 }
  0xc7   : > { %v402_v22 = vpop.f32.mrf.mxu3 }
  0xc8   : > { %v403_v23 = vadd.f32 %v402_v22, %v305_v21 }
  0xca   : > { %428 = vst [vmem:[%s743_s17 + $0x58] sm:$0xff] %v403_v23  ;;  %v284_v24 = vpop.f32.mrf.mxu0  ;;  %v381_v25 = vpop.f32.mrf.mxu1 }
  0xcb   : > { %v382_v26 = vadd.f32 %v381_v25, %v284_v24 }
  0xcd   : > { %421 = vst [vmem:[%s743_s17 + $0x20] sm:$0xff] %v382_v26 }
  0xce   : > { %v308_v27 = vpop.f32.mrf.mxu2 }
  0xcf   : > { %v405_v28 = vpop.f32.mrf.mxu3 }
  0xd0   : > { %v406_v29 = vadd.f32 %v405_v28, %v308_v27 }
  0xd2   : > { %429 = vst [vmem:[%s743_s17 + $0x60] sm:$0xff] %v406_v29  ;;  %v287_v30 = vpop.f32.mrf.mxu0  ;;  %v384_v31 = vpop.f32.mrf.mxu1 }
  0xd3   : > { %v385_v32 = vadd.f32 %v384_v31, %v287_v30 }
  0xd5   : > { %422 = vst [vmem:[%s743_s17 + $0x28] sm:$0xff] %v385_v32 }
  0xd6   : > { %v311_v33 = vpop.f32.mrf.mxu2 }
  0xd7   : > { %v408_v34 = vpop.f32.mrf.mxu3 }
  0xd8   : > { %v409_v35 = vadd.f32 %v408_v34, %v311_v33 }
  0xda   : > { %430 = vst [vmem:[%s743_s17 + $0x68] sm:$0xff] %v409_v35  ;;  %v290_v36 = vpop.f32.mrf.mxu0  ;;  %v387_v37 = vpop.f32.mrf.mxu1 }
  0xdb   : > { %v388_v38 = vadd.f32 %v387_v37, %v290_v36 }
  0xdd   : > { %423 = vst [vmem:[%s743_s17 + $0x30] sm:$0xff] %v388_v38 }
  0xde   : > { %v314_v39 = vpop.f32.mrf.mxu2 }
  0xdf   : > { %v411_v40 = vpop.f32.mrf.mxu3 }
  0xe0   : > { %v412_v41 = vadd.f32 %v411_v40, %v314_v39 }
  0xe2   : > { %431 = vst [vmem:[%s743_s17 + $0x70] sm:$0xff] %v412_v41  ;;  %v293_v42 = vpop.f32.mrf.mxu0  ;;  %v390_v43 = vpop.f32.mrf.mxu1 }
  0xe3   : > { %v391_v44 = vadd.f32 %v390_v43, %v293_v42 }
  0xe5   : > { %424 = vst [vmem:[%s743_s17 + $0x38] sm:$0xff] %v391_v44 }
  0xe6   : > { %v317_v45 = vpop.f32.mrf.mxu2 }
  0xe7   : > { %v414_v46 = vpop.f32.mrf.mxu3 }
  0xe8   : > { %v415_v47 = vadd.f32 %v414_v46, %v317_v45 }
  0xea   : > { %432 = vst [vmem:[%s743_s17 + $0x78] sm:$0xff] %v415_v47 }
  0xeb PF: > { %s14_s15 = sadd.s32 1, %s560_s15  }
  0xec   : > { %p11_p4 = scmp.ge.s32.totalorder %s14_s15, 4  }
  0xee   :  { %13 = sbr.rel (!%p11_p4) target bundleno = 1 (0x1), region = 69 }

</bundles_post_ra>
